<compile_context>
chip_gen: v5e
topology: v5e:2x2
jax: 0.10.0
libtpu: 0.0.40
codegen_flags: <defaults>
</compile_context>

<pallas_src>
import jax
import jax.numpy as jnp
import numpy as np
from jax.experimental import pallas as pl
from jax.experimental.pallas import tpu as pltpu

EPS = 1e-8


def _make_sel(h, w, oH, oW):
    """(hw, ohw) 0/1 f32 nearest-neighbour selection matrix, built host-side once.

    sel[k, j] = 1 iff output flat position j maps (F.interpolate 'nearest') to
    input flat position k.  Exactly one nonzero per column.
    """
    hw, ohw = h * w, oH * oW
    j = np.arange(ohw)
    p, q = j // oW, j % oW
    src = (p * h // oH) * w + (q * w // oW)                       # source flat idx per output pos
    sel = (src[None, :] == np.arange(hw)[:, None]).astype(np.float32)
    assert sel.shape == (hw, ohw)
    return jnp.asarray(sel)


def _make_kernel(tb, hw, ohw):
    hi = jax.lax.Precision.HIGHEST

    def kernel(xin_ref, sel_ref, ore_ref, oim_ref):
        # xin_ref : (1, 3*tb, hw) f32 — rows [0:tb)=re, [tb:2tb)=im, [2tb:3tb)=idx (as f32)
        # sel_ref : (hw, ohw)     f32 — constant, resident across grid steps
        # ore_ref / oim_ref : (1, tb, ohw) f32 — lane-dense output rows
        xin = xin_ref[0]                                          # (3*tb, hw)
        sel = sel_ref[...]                                        # (hw, ohw)

        # ---- single MXU pass: nearest-neighbour upsample of re / im / idx ----
        up = jnp.dot(xin, sel, preferred_element_type=jnp.float32, precision=hi)
        re_up = up[0 * tb:1 * tb]                                 # (tb, ohw)
        im_up = up[1 * tb:2 * tb]
        idx_up = up[2 * tb:3 * tb]

        # ---- magnitude + stable-angle cos/sin on the upsampled domain (VPU + EUP) ----
        mag = jnp.sqrt(re_up * re_up + im_up * im_up)             # unclamped imag
        im_safe = jnp.where((im_up < EPS) & (im_up > -EPS), jnp.float32(EPS), im_up)
        rinv = jax.lax.rsqrt(re_up * re_up + im_safe * im_safe)   # > 0 always
        cos_up = re_up * rinv
        sin_up = im_safe * rinv

        # ---- upsample-and-compare scatter: keep the magnitude only at the
        #      output position its pooling index points to ----
        j_f = jax.lax.broadcasted_iota(jnp.int32, (tb, ohw), 1).astype(jnp.float32)
        scat = jnp.where(jnp.abs(idx_up - j_f) < 0.5, mag, jnp.float32(0.0))

        # ---- out = magnitude * exp(1j * phase), full lane-dense stores ----
        ore_ref[0] = scat * cos_up
        oim_ref[0] = scat * sin_up

    return kernel


def _pick_tb(bc, requested=None):
    if requested is not None:
        return max(1, min(requested, bc))
    cap = 256                              # MXU M tile (v6e/v7x); multiple passes on v5e are fine
    if bc <= cap:
        # >= 2 balanced steps whenever possible so both v7x TensorCores get work
        # (the extra ~0.35us step on single-TC v5e/v6e is negligible).
        return max(1, (bc + 1) // 2) if bc >= 2 else 1
    nsteps = 2 * pl.cdiv(bc, 2 * cap)      # even step count, tb near the MXU tile
    return pl.cdiv(bc, nsteps)


def complex_max_unpool2d(x_re, x_im, index, out_shape, tb=None):
    """x_re/x_im: (b,c,h,w) float32; index: (b,c,h,w) int; returns (b,c,oH,oW) complex64."""
    b, c, h, w = x_re.shape
    oH, oW = out_shape
    bc, hw, ohw = b * c, h * w, oH * oW

    tb = _pick_tb(bc, tb)
    nsteps = pl.cdiv(bc, tb)
    bc_pad = nsteps * tb

    xre = x_re.reshape(bc, hw)
    xim = x_im.reshape(bc, hw)
    idxf = index.reshape(bc, hw).astype(jnp.float32)   # exact for ohw < 2^24
    if bc_pad != bc:                       # pad to whole tiles (rows dropped later)
        pad = bc_pad - bc
        xre = jnp.pad(xre, ((0, pad), (0, 0)))
        xim = jnp.pad(xim, ((0, pad), (0, 0)))
        idxf = jnp.pad(idxf, ((0, pad), (0, 0)))

    # layout plumbing (XLA glue): one row-layout input per grid step holding
    # [re rows | im rows | idx rows] so the kernel does a single matmul on it.
    xin = jnp.concatenate(
        [xre.reshape(nsteps, tb, hw),
         xim.reshape(nsteps, tb, hw),
         idxf.reshape(nsteps, tb, hw)], axis=1)        # (nsteps, 3*tb, hw)

    sel = _make_sel(h, w, oH, oW)                      # (hw, ohw) constant

    blk3 = lambda i: (i, 0, 0)
    out_re, out_im = pl.pallas_call(
        _make_kernel(tb, hw, ohw),
        grid=(nsteps,),
        in_specs=[
            pl.BlockSpec((1, 3 * tb, hw), blk3),
            pl.BlockSpec((hw, ohw), lambda i: (0, 0)),   # DMA'd once, resident
        ],
        out_specs=(
            pl.BlockSpec((1, tb, ohw), blk3),
            pl.BlockSpec((1, tb, ohw), blk3),
        ),
        out_shape=(
            jax.ShapeDtypeStruct((nsteps, tb, ohw), jnp.float32),
            jax.ShapeDtypeStruct((nsteps, tb, ohw), jnp.float32),
        ),
        compiler_params=pltpu.CompilerParams(dimension_semantics=("parallel",)),
    )(xin, sel)

    out_re = out_re.reshape(bc_pad, oH, oW)[:bc].reshape(b, c, oH, oW)
    out_im = out_im.reshape(bc_pad, oH, oW)[:bc].reshape(b, c, oH, oW)
    return jax.lax.complex(out_re, out_im)


def reference_unpool(x_re, x_im, index, out_shape):
    """Pure-JAX mirror of the PyTorch forward (for verification)."""
    b, c, h, w = x_re.shape
    oH, oW = out_shape
    mag = jnp.sqrt(x_re ** 2 + x_im ** 2).reshape(b, c, h * w)
    idxf = index.reshape(b, c, h * w)
    scat = jnp.zeros((b, c, oH * oW), jnp.float32)
    scat = jax.vmap(jax.vmap(lambda e, i, m: e.at[i].set(m)))(scat, idxf, mag)
    scat = scat.reshape(b, c, oH, oW)
    im_safe = jnp.where((x_im < EPS) & (x_im > -EPS), EPS, x_im)
    phase = jnp.arctan2(im_safe, x_re)
    rows = (jnp.arange(oH) * h) // oH
    cols = (jnp.arange(oW) * w) // oW
    ph_up = phase[:, :, rows, :][:, :, :, cols]
    return (scat * jnp.cos(ph_up)) + 1j * (scat * jnp.sin(ph_up))


if __name__ == "__main__":
    b, c, h, w = 2, 4, 8, 8
    out_shape = (16, 16)
    oH, oW = out_shape

    key = jax.random.PRNGKey(0)
    k1, k2, k3, k4 = jax.random.split(key, 4)
    x_re = jax.random.normal(k1, (b, c, h, w), jnp.float32)
    x_im = jax.random.normal(k2, (b, c, h, w), jnp.float32)
    # indices consistent with a 2x2 max-pool over a (oH, oW) map (one unique index per window)
    di = jax.random.randint(k3, (b, c, h, w), 0, 2)
    dj = jax.random.randint(k4, (b, c, h, w), 0, 2)
    rows = jnp.arange(h)[:, None] * 2 + di
    cols = jnp.arange(w)[None, :] * 2 + dj
    index = (rows * oW + cols).astype(jnp.int32)

    out = complex_max_unpool2d(x_re, x_im, index, out_shape)
    out = jax.block_until_ready(out)

    ref = reference_unpool(x_re, x_im, index, out_shape)
    assert out.shape == (b, c, oH, oW)
    assert out.dtype == jnp.complex64
    np.testing.assert_allclose(np.asarray(out.real), np.asarray(ref.real),
                               atol=1e-4, rtol=1e-4)
    np.testing.assert_allclose(np.asarray(out.imag), np.asarray(ref.imag),
                               atol=1e-4, rtol=1e-4)
    print("KERNEL_OK")
</pallas_src>

<mosaic_0001>
module attributes {stable_mosaic.version = 11 : i64} {
  func.func @kernel(%arg0: i32, %arg1: memref<1x12x64xf32, #tpu.memory_space<vmem>>, %arg2: memref<64x256xf32, #tpu.memory_space<vmem>>, %arg3: memref<1x4x256xf32, #tpu.memory_space<vmem>>, %arg4: memref<1x4x256xf32, #tpu.memory_space<vmem>>) attributes {dimension_semantics = [#tpu.dimension_semantics<parallel>], iteration_bounds = array<i64: 2>, scalar_prefetch = 0 : i64, scratch_operands = 0 : i64, tpu.core_type = #tpu.core_type<tc>, window_params = [{transform_indices = @transform_0, window_bounds = array<i64: 1, 12, 64>}, {pipeline_mode = #tpu.pipeline_mode<synchronous>, transform_indices = @transform_1, window_bounds = array<i64: 64, 256>}, {transform_indices = @transform_2, window_bounds = array<i64: 1, 4, 256>}, {transform_indices = @transform_3, window_bounds = array<i64: 1, 4, 256>}]} {
    %c0 = arith.constant 0 : index
    %c0_0 = arith.constant 0 : index
    %c0_1 = arith.constant 0 : index
    %0 = vector.load %arg1[%c0, %c0_0, %c0_1] : memref<1x12x64xf32, #tpu.memory_space<vmem>>, vector<1x12x64xf32>
    %1 = vector.shape_cast %0 : vector<1x12x64xf32> to vector<12x64xf32>
    %c0_2 = arith.constant 0 : index
    %c0_3 = arith.constant 0 : index
    %2 = vector.load %arg2[%c0_2, %c0_3] : memref<64x256xf32, #tpu.memory_space<vmem>>, vector<64x256xf32>
    %cst = arith.constant dense<0.000000e+00> : vector<12x256xf32>
    %3 = tpu.matmul %1, %2, %cst {dimension_numbers = #tpu.dot_dimension_numbers<[1], [0], [0], [1], [0, 0, 1, 1], [], []>, precision = #tpu.contract_precision<fp32>} : vector<12x64xf32>, vector<64x256xf32>, vector<12x256xf32> -> vector<12x256xf32>
    %4 = vector.extract_strided_slice %3 {offsets = [0, 0], sizes = [4, 256], strides = [1, 1]} : vector<12x256xf32> to vector<4x256xf32>
    %5 = vector.extract_strided_slice %3 {offsets = [4, 0], sizes = [4, 256], strides = [1, 1]} : vector<12x256xf32> to vector<4x256xf32>
    %6 = vector.extract_strided_slice %3 {offsets = [8, 0], sizes = [4, 256], strides = [1, 1]} : vector<12x256xf32> to vector<4x256xf32>
    %7 = arith.mulf %4, %4 : vector<4x256xf32>
    %8 = arith.mulf %5, %5 : vector<4x256xf32>
    %9 = arith.addf %7, %8 : vector<4x256xf32>
    %10 = math.sqrt %9 : vector<4x256xf32>
    %cst_4 = arith.constant 9.99999993E-9 : f32
    %11 = vector.broadcast %cst_4 : f32 to vector<4x256xf32>
    %12 = arith.cmpf olt, %5, %11 : vector<4x256xf32>
    %cst_5 = arith.constant -9.99999993E-9 : f32
    %13 = vector.broadcast %cst_5 : f32 to vector<4x256xf32>
    %14 = arith.cmpf ogt, %5, %13 : vector<4x256xf32>
    %15 = arith.andi %12, %14 : vector<4x256xi1>
    %cst_6 = arith.constant 9.99999993E-9 : f32
    %16 = vector.broadcast %cst_6 : f32 to vector<4x256xf32>
    %17 = arith.select %15, %16, %5 : vector<4x256xi1>, vector<4x256xf32>
    %18 = arith.mulf %4, %4 : vector<4x256xf32>
    %19 = arith.mulf %17, %17 : vector<4x256xf32>
    %20 = arith.addf %18, %19 : vector<4x256xf32>
    %21 = math.rsqrt %20 : vector<4x256xf32>
    %22 = arith.mulf %4, %21 : vector<4x256xf32>
    %23 = arith.mulf %17, %21 : vector<4x256xf32>
    %24 = tpu.iota {dimensions = array<i32: 1>} : vector<4x256xi32>
    %25 = arith.sitofp %24 : vector<4x256xi32> to vector<4x256xf32>
    %26 = arith.subf %6, %25 : vector<4x256xf32>
    %27 = math.absf %26 : vector<4x256xf32>
    %cst_7 = arith.constant 5.000000e-01 : f32
    %28 = vector.broadcast %cst_7 : f32 to vector<4x256xf32>
    %29 = arith.cmpf olt, %27, %28 : vector<4x256xf32>
    %cst_8 = arith.constant 0.000000e+00 : f32
    %30 = vector.broadcast %cst_8 : f32 to vector<4x256xf32>
    %31 = arith.select %29, %10, %30 : vector<4x256xi1>, vector<4x256xf32>
    %32 = arith.mulf %31, %22 : vector<4x256xf32>
    %c0_9 = arith.constant 0 : index
    %c0_10 = arith.constant 0 : index
    %c0_11 = arith.constant 0 : index
    %33 = vector.load %arg3[%c0_9, %c0_10, %c0_11] : memref<1x4x256xf32, #tpu.memory_space<vmem>>, vector<1x4x256xf32>
    %34 = vector.shape_cast %33 : vector<1x4x256xf32> to vector<4x256xf32>
    %35 = vector.shape_cast %32 : vector<4x256xf32> to vector<1x4x256xf32>
    tpu.vector_store %arg3[%c0_9, %c0_10, %c0_11], %35 {strides = array<i32>} : memref<1x4x256xf32, #tpu.memory_space<vmem>>, vector<1x4x256xf32>,
    %36 = arith.mulf %31, %23 : vector<4x256xf32>
    %c0_12 = arith.constant 0 : index
    %c0_13 = arith.constant 0 : index
    %c0_14 = arith.constant 0 : index
    %37 = vector.load %arg4[%c0_12, %c0_13, %c0_14] : memref<1x4x256xf32, #tpu.memory_space<vmem>>, vector<1x4x256xf32>
    %38 = vector.shape_cast %37 : vector<1x4x256xf32> to vector<4x256xf32>
    %39 = vector.shape_cast %36 : vector<4x256xf32> to vector<1x4x256xf32>
    tpu.vector_store %arg4[%c0_12, %c0_13, %c0_14], %39 {strides = array<i32>} : memref<1x4x256xf32, #tpu.memory_space<vmem>>, vector<1x4x256xf32>,
    return
  }
  func.func @transform_0(%arg0: i32) -> (i32, i32, i32) {
    %c0_i32 = arith.constant 0 : i32
    %c0_i32_0 = arith.constant 0 : i32
    %c0_i32_1 = arith.constant 0 : i32
    return %arg0, %c0_i32, %c0_i32_0 : i32, i32, i32
  }
  func.func @transform_1(%arg0: i32) -> (i32, i32) {
    %c0_i32 = arith.constant 0 : i32
    %c0_i32_0 = arith.constant 0 : i32
    %c0_i32_1 = arith.constant 0 : i32
    return %c0_i32, %c0_i32_0 : i32, i32
  }
  func.func @transform_2(%arg0: i32) -> (i32, i32, i32) {
    %c0_i32 = arith.constant 0 : i32
    %c0_i32_0 = arith.constant 0 : i32
    %c0_i32_1 = arith.constant 0 : i32
    return %arg0, %c0_i32, %c0_i32_0 : i32, i32, i32
  }
  func.func @transform_3(%arg0: i32) -> (i32, i32, i32) {
    %c0_i32 = arith.constant 0 : i32
    %c0_i32_0 = arith.constant 0 : i32
    %c0_i32_1 = arith.constant 0 : i32
    return %arg0, %c0_i32, %c0_i32_0 : i32, i32, i32
  }
}

</mosaic_0001>

<bundles_post_ra>
// kernel: tpu_custom_call.1
= control target key start
LH: loop header
LB: loop body
LE: loop exit
PB: predicated region body
PF: predicated region fallthrough
CT: control target
= control target key end

     0   :  { %9 = vsyncpa [#allocation3], 0  ;;  %s1718_s0 = inlined_call_operand.vmem [shape: f32[2,12,64], index: 0, kind: input, shape index: {}]   ;;  %s1719_s1 = inlined_call_operand.hbm [shape: f32[64,256], index: 1, kind: input, shape index: {}]   ;;  %s1720_s2 = inlined_call_operand.hbm [shape: f32[2,4,256], index: 2, kind: output, shape index: {0}]   ;;  %s1721_s3 = inlined_call_operand.hbm [shape: f32[2,4,256], index: 3, kind: output, shape index: {1}]  }
   0x1   :  { %10 = vsyncpa [#allocation4], 0 }
   0x2   :  { %12 = vsyncpa [#allocation4 + $0x1], 0 }
   0x3   :  { %13 = vsyncpa [#allocation7], 0 }
   0x4   :  { %15 = vsyncpa [#allocation7 + $0x1], 0  ;;  %s1256_s12 = smov 0   ;;  %s1258_s13 = smov 0  }
   0x5   :  { %s1260_s14 = smov 0   ;;  %s1262_s15 = smov 0  }
   0x6 LB: > { %s1277_s16 = sadd.s32 4294967295, %s1231_s15   ;;  %s1017_s17 = sadd.s32 4294967294, %s1231_s15   ;;  %s1231_s15 = sphi %s1262_s15, %s1727_s15   ;;  %s1227_s14 = sphi %s1260_s14, %s1726_s14   ;;  %s1223_s13 = sphi %s1258_s13, %s1725_s13   ;;  %s1219_s12 = sphi %s1256_s12, %s1724_s12  }
   0x7   : > { %s1281_s18 = sadd.s32 1, %s1231_s15   ;;  %s75_s19 = sadd.s32 1, %s1227_s14 }
   0x8   : > { %s72_s20 = ssub.s32 %s1231_s15, %s1281_s18  ;;  %p85_p0 = scmp.ne.s32.totalorder %s1227_s14, %s1223_s13 }
   0x9   : > { %p73_p1 = scmp.eq.s32.totalorder %s72_s20, 0  ;;  %p86_p2 = scmp.eq.s32.totalorder %s1277_s16, 1 }
   0xa   : > { %p91_p3 = scmp.ne.s32.totalorder %s1223_s13, %s1219_s12  ;;  %p92_p4 = scmp.eq.s32.totalorder %s1017_s17, 1 }
   0xb   : > { %s1292_s21 = scalar_select %p73_p1, %s1227_s14, %s75_s19  }
   0xc   : > { %p1294_p5 = por %p86_p2, %p85_p0  ;;  %p1298_p6 = por %p92_p4, %p91_p3 }
   0xd   : > { %p1018_p7 = scmp.ge.s32.totalorder %s1231_s15, 1  ;;  %p125_p8 = scmp.lt.s32.totalorder %s1231_s15, 3 }
   0xe   : > { %p1057_p9 = scmp.eq.s32.totalorder %s1277_s16, 0  ;;  %s136_s26 = sshll.u32 %s1719_s1, 4  ;;  %s137_s26 = int_to_ptr.hbm [resolvable:$true] %s136_s26 }
   0xf   : > { %p126_p10 = pnand %p1018_p7, %p125_p8  ;;  %s1233_s27 = smov [#allocation2]  }
  0x10   : > { %s138_s28 = sshll.u32 %s1233_s27, 4  ;;  %s1234_s29 = smov 256   ;;  %s139_s28 = int_to_ptr.vmem [resolvable:$true] %s138_s28 }
  0x11   : > { %p1046_p11 = pneg %p126_p10  ;;  %s1235_s30 = smov 16  }
  0x12   : > { %162 = sbr.rel (%p126_p10) target bundleno = 271 (0x10f), region = 28 }
  0x13   : > { %p1047_p12 = pnand %p1057_p9, %p1046_p11 }
  0x15   : > { %1049 = dma.hbm_to_vmem [thread:$0]  (!%p1047_p12), %s137_s26, 2048, %s139_s28, [#allocation3], %s1234_s29, %s1234_s29, %s1235_s30  }
  0x17   : > { %1206 = dma.done.wait (%p1057_p9), [#allocation3], 2048  }
  0x18   : > { %1208 = vsyncadd (%p1057_p9), [#allocation3], 4294965248  ;;  %p192_p13 = scmp.lt.s32.totalorder %s1277_s16, 1  ;;  %v213_v0 = vld [vmem:[#allocation2 + $0x70] sm:$0xff]  ;;  %v211_v1 = vld [vmem:[#allocation2 + $0x60] sm:$0xff]  ;;  %vm215_vm0 = vcmask 523264  }
  0x19   : > { %v209_v2 = vld [vmem:[#allocation2 + $0x50] sm:$0xff]  ;;  %v1321_v3 = vand.u32 4294901760, %v213_v0  ;;  %v1323_v4 = vand.u32 4294901760, %v211_v1  ;;  %v207_v6 = vld [vmem:[#allocation2 + $0x40] sm:$0xff]  ;;  %v214_v35 = vld [vmem:[#allocation2 + $0x78] sm:$0xff]  ;;  %s1652_s9 = sand.u32 1, %s1223_s13  }
  0x1a   : > { %s193_s4 = scalar_select %p192_p13, %s1277_s16, 1  ;;  %v1325_v5 = vand.u32 4294901760, %v209_v2  ;;  %v205_v7 = vld [vmem:[#allocation2 + $0x30] sm:$0xff]  ;;  %v203_v8 = vld [vmem:[#allocation2 + $0x20] sm:$0xff]  ;;  %v1327_v9 = vand.u32 4294901760, %v207_v6  ;;  %v212_v37 = vld [vmem:[#allocation2 + $0x68] sm:$0xff] }
  0x1b   : > { %v1329_v10 = vand.u32 4294901760, %v205_v7  ;;  %v1331_v11 = vand.u32 4294901760, %v203_v8  ;;  %v201_v12 = vld [vmem:[#allocation2 + $0x10] sm:$0xff]  ;;  %v199_v13 = vld [vmem:[#allocation2] sm:$0xff]  ;;  %231 = vmatpush.msra.mxu0 %v1321_v3  ;;  %v1336_v15 = vsub.f32 %v213_v0, %v1321_v3  ;;  %380 = vmatpush.msra.mxu3 %v1321_v3  ;;  %v1340_v16 = vsub.f32 %v211_v1, %v1323_v4  ;;  %v210_v43 = vld [vmem:[#allocation2 + $0x58] sm:$0xff]  ;;  %s1036_s10 = sshll.u32 %s1277_s16, 3 }
  0x1c   : > { %s1035_s5 = sshll.u32 %s193_s4, 4  ;;  %v1343_v17 = vsub.f32 %v209_v2, %v1325_v5  ;;  %v1345_v18 = vand.u32 4294901760, %v201_v12  ;;  %v1348_v19 = vsub.f32 %v207_v6, %v1327_v9  ;;  %v1353_v21 = vand.u32 4294901760, %v199_v13  ;;  %v208_v51 = vld [vmem:[#allocation2 + $0x48] sm:$0xff]  ;;  %v206_v60 = vld [vmem:[#allocation2 + $0x38] sm:$0xff]  ;;  %s1023_s11 = sshll.u32 %s1652_s9, 3 }
  0x1d   : > { %s1319_s8 = scalar_lea.vmem %s1718_s0, %s1035_s5  ;;  %v1351_v20 = vsub.f32 %v205_v7, %v1329_v10  ;;  %v1356_v22 = vsub.f32 %v203_v8, %v1331_v11  ;;  %233 = vmatpush.msra.mxu0 %v1323_v4  ;;  %338 = vmatpush.msra.mxu2 %v1336_v15  ;;  %v273_v23 = vand.u32 4294901760, %v1336_v15  ;;  %v279_v24 = vand.u32 4294901760, %v1340_v16  ;;  %v204_v1 = vld [vmem:[#allocation2 + $0x28] sm:$0xff]  ;;  %s893_s19 = scalar_lea.hbm %s1720_s2, %s1036_s10 }
  0x1e   : > { %v197_v14 = vld [vmem:[%s1319_s8] sm:$0xff]  ;;  %v285_v25 = vand.u32 4294901760, %v1343_v17  ;;  %382 = vmatpush.msra.mxu3 %v1323_v4  ;;  %v291_v27 = vand.u32 4294901760, %v1348_v19  ;;  %v1370_v30 = vsub.f32 %v201_v12, %v1345_v18  ;;  %v1394_v41 = vsub.f32 %v199_v13, %v1353_v21  ;;  %v198_v42 = vld [vmem:[%s1319_s8 + $0x8] sm:$0xf]  ;;  %s184_s20 = scalar_lea.vmem [#allocation5], %s1023_s11  ;;  %s1674_s28 = scalar_lea.hbm %s1721_s3, %s1036_s10 }
  0x1f   : > { %v217_v26 = vsel %vm215_vm0, %v197_v14, 0  ;;  %v297_v29 = vand.u32 4294901760, %v1351_v20  ;;  %235 = vmatpush.msra.mxu0 %v1325_v5  ;;  %341 = vmatpush.msra.mxu2 %v1340_v16  ;;  %v274_v31 = vsub.f32 %v1336_v15, %v273_v23  ;;  %v280_v32 = vsub.f32 %v1340_v16, %v279_v24  ;;  %s895_s24 = sshll.u32 %s184_s20, 4  ;;  %s897_s25 = sshll.u32 %s893_s19, 4  ;;  %s896_s24 = int_to_ptr.vmem [resolvable:$true] %s895_s24  ;;  %s898_s25 = int_to_ptr.hbm [resolvable:$true] %s897_s25 }
  0x20   : > { %v1366_v28 = vand.u32 4294901760, %v217_v26  ;;  %v286_v33 = vsub.f32 %v1343_v17, %v285_v25  ;;  %v303_v34 = vand.u32 4294901760, %v1356_v22  ;;  %384 = vmatpush.msra.mxu3 %v1325_v5  ;;  %v292_v40 = vsub.f32 %v1348_v19, %v291_v27  ;;  %s191_s29 = scalar_lea.vmem [#allocation6], %s1023_s11  ;;  %s912_s4 = sshll.u32 %s1674_s28, 4  ;;  %s913_s4 = int_to_ptr.hbm [resolvable:$true] %s912_s4 }
  0x21   : > { %237 = vmatpush.msra.mxu0 %v1327_v9  ;;  %v275_v38 = vand.u32 4294901760, %v274_v31  ;;  %344 = vmatpush.msra.mxu2 %v1343_v17  ;;  %v281_v39 = vand.u32 4294901760, %v280_v32  ;;  %v298_v45 = vsub.f32 %v1351_v20, %v297_v29  ;;  %v1404_v46 = vand.u32 4294901760, %v214_v35  ;;  %v202_v31 = vld [vmem:[#allocation2 + $0x18] sm:$0xff]  ;;  %s910_s30 = sshll.u32 %s191_s29, 4  ;;  %s877_s5 = scalar_lea.sflag [#allocation4], %s1652_s9  ;;  %s911_s30 = int_to_ptr.vmem [resolvable:$true] %s910_s30 }
  0x22   : > { %v1386_v36 = vsub.f32 %v217_v26, %v1366_v28  ;;  %386 = vmatpush.msra.mxu3 %v1327_v9  ;;  %v287_v47 = vand.u32 4294901760, %v286_v33  ;;  %v304_v48 = vsub.f32 %v1356_v22, %v303_v34  ;;  %v309_v49 = vand.u32 4294901760, %v1370_v30  ;;  %s1147_s6 = sshra.s32 %s898_s25, 4  ;;  %s1153_s16 = scalar_lea.hbm %s1720_s2, 16  ;;  %s1148_s6 = int_to_ptr.hbm [resolvable:$true] %s1147_s6 }
  0x23   : > { %239 = vmatpush.msra.mxu0 %v1329_v10  ;;  %276 = vmatpush.msra.mxu1 %v275_v38  ;;  %v1411_v50 = vand.u32 4294901760, %v212_v37  ;;  %v1418_v53 = vsub.f32 %v214_v35, %v1404_v46  ;;  %v220_v54 = vsel %vm215_vm0, %v198_v42, 0  ;;  %v1421_v55 = vand.u32 4294901760, %v210_v43  ;;  %s1149_s7 = scalar_lea.hbm %s1148_s6, 8  ;;  %p1154_p3 = scmp.lt.s32.totalorder %s1148_s6, %s1720_s2 }
  0x24   : > { %v1399_v44 = vand.u32 4294901760, %v1386_v36  ;;  %347 = vmatpush.msra.mxu2 %v1348_v19  ;;  %388 = vmatpush.msra.mxu3 %v1329_v10  ;;  %v293_v56 = vand.u32 4294901760, %v292_v40  ;;  %v315_v57 = vand.u32 4294901760, %v1394_v41  ;;  %v1428_v59 = vand.u32 4294901760, %v220_v54  ;;  %v200_v40 = vld [vmem:[#allocation2 + $0x8] sm:$0xff]  ;;  %p1150_p0 = scmp.ne.s32.totalorder %s1148_s6, %s1149_s7  ;;  %p1155_p4 = scmp.lt.s32.totalorder %s1153_s16, %s1149_s7 }
  0x25   : > { %241 = vmatpush.msra.mxu0 %v1331_v11  ;;  %282 = vmatpush.msra.mxu1 %v281_v39  ;;  %v1426_v58 = vsub.f32 %v212_v37, %v1411_v50  ;;  %v541_v62 = vand.u32 4294901760, %v1418_v53  ;;  %v1436_v63 = vsub.f32 %v210_v43, %v1421_v55  ;;  %v1438_v0 = vand.u32 4294901760, %v208_v51 }
  0x26   : > { %v249_v52 = vsub.f32 %v1386_v36, %v1399_v44  ;;  %350 = vmatpush.msra.mxu2 %v1351_v20  ;;  %390 = vmatpush.msra.mxu3 %v1331_v11  ;;  %v299_v2 = vand.u32 4294901760, %v298_v45  ;;  %v310_v6 = vsub.f32 %v1370_v30, %v309_v49  ;;  %v1446_v8 = vsub.f32 %v220_v54, %v1428_v59  ;;  %p1151_p1 = pnand %p1150_p0, %p1294_p5  ;;  %p1156_p7 = por %p1155_p4, %p1154_p3 }
  0x27   : > { %243 = vmatpush.msra.mxu0 %v1345_v18  ;;  %288 = vmatpush.msra.mxu1 %v287_v47  ;;  %v547_v7 = vand.u32 4294901760, %v1426_v58  ;;  %v305_v12 = vand.u32 4294901760, %v304_v48  ;;  %v542_v13 = vsub.f32 %v1418_v53, %v541_v62  ;;  %v1454_v14 = vsub.f32 %v208_v51, %v1438_v0 }
  0x28   : > { %v1432_v61 = vand.u32 4294901760, %v249_v52  ;;  %353 = vmatpush.msra.mxu2 %v1356_v22  ;;  %392 = vmatpush.msra.mxu3 %v1345_v18  ;;  %v1456_v26 = vand.u32 4294901760, %v206_v60  ;;  %v316_v32 = vsub.f32 %v1394_v41, %v315_v57  ;;  %v1463_v33 = vand.u32 4294901760, %v1446_v8  ;;  %p1152_p2 = pneg %p1151_p1 }
  0x29   : > { %245 = vmatpush.msra.mxu0 %v1353_v21  ;;  %294 = vmatpush.msra.mxu1 %v293_v56  ;;  %v553_v35 = vand.u32 4294901760, %v1436_v63  ;;  %v1466_v37 = vand.u32 4294901760, %v204_v1  ;;  %v548_v38 = vsub.f32 %v1426_v58, %v547_v7  ;;  %v311_v42 = vand.u32 4294901760, %v310_v6 }
  0x2a   : > { %251 = vmatmul.f32.vlgmr.msra.gmra.mxu0 %v1432_v61  ;;  %356 = vmatpush.msra.mxu2 %v1370_v30  ;;  %v1474_v39 = vsub.f32 %v206_v60, %v1456_v26  ;;  %v257_v43 = vsub.f32 %v1446_v8, %v1463_v33  ;;  %v559_v45 = vand.u32 4294901760, %v1454_v14  ;;  %v1481_v47 = vand.u32 4294901760, %v202_v31  ;;  %p1157_p8 = pnand %p1156_p7, %p1152_p2 }
  0x2b   : > { %300 = vmatpush.msra.mxu1 %v299_v2  ;;  %419 = vmatpush.msrb.mxu0 %v273_v23  ;;  %v543_v48 = vand.u32 4294901760, %v542_v13  ;;  %v1486_v51 = vsub.f32 %v204_v1, %v1466_v37  ;;  %v317_v15 = vand.u32 4294901760, %v316_v32  ;;  %v554_v23 = vsub.f32 %v1436_v63, %v553_v35 }
  0x2c   : > { %359 = vmatpush.msra.mxu2 %v1394_v41  ;;  %394 = vmatpush.msra.mxu3 %v1353_v21  ;;  %v1493_v52 = vand.u32 4294901760, %v200_v40  ;;  %v549_v54 = vand.u32 4294901760, %v548_v38  ;;  %v565_v56 = vand.u32 4294901760, %v1474_v39  ;;  %v1499_v60 = vand.u32 4294901760, %v257_v43 }
  0x2d   : > { %306 = vmatpush.msra.mxu1 %v305_v12  ;;  %423 = vmatpush.msrb.mxu0 %v279_v24  ;;  %v560_v16 = vsub.f32 %v1454_v14, %v559_v45  ;;  %v1505_v24 = vsub.f32 %v202_v31, %v1481_v47  ;;  %v571_v1 = vand.u32 4294901760, %v1486_v51  ;;  %v555_v2 = vand.u32 4294901760, %v554_v23 }
  0x2e   : > { %362 = vmatmul.f32.vlgmr.msra.gmra.mxu2 %v1386_v36  ;;  %398 = vmatmul.f32.vlgmr.msra.gmra.mxu3 %v1399_v44  ;;  %v1512_v6 = vsub.f32 %v200_v40, %v1493_v52  ;;  %v566_v12 = vsub.f32 %v1474_v39, %v565_v56 }
  0x2f   : > { %499 = vmatpush.msrb.mxu2 %v1404_v46  ;;  %312 = vmatpush.msra.mxu1 %v311_v42  ;;  %v561_v17 = vand.u32 4294901760, %v560_v16  ;;  %v572_v19 = vsub.f32 %v1486_v51, %v571_v1 }
  0x30   : > { %427 = vmatpush.msrb.mxu0 %v285_v25  ;;  %544 = vmatpush.msrb.mxu3 %v543_v48  ;;  %v577_v25 = vand.u32 4294901760, %v1505_v24  ;;  %v567_v13 = vand.u32 4294901760, %v566_v12 }
  0x31   : > { %501 = vmatpush.msrb.mxu2 %v1411_v50  ;;  %318 = vmatpush.msra.mxu1 %v317_v15  ;;  %v573_v20 = vand.u32 4294901760, %v572_v19 }
  0x32   : > { %431 = vmatpush.msrb.mxu0 %v291_v27  ;;  %550 = vmatpush.msrb.mxu3 %v549_v54  ;;  %v583_v27 = vand.u32 4294901760, %v1512_v6 }
  0x33   : > { %259 = vmatmul.f32.gmra.mxu0 %v1499_v60  ;;  %320 = vmatmul.f32.vlgmr.msra.gmra.mxu1 %v1366_v28 }
  0x34   : > { %466 = vmatpush.msrb.mxu1 %v1321_v3  ;;  %503 = vmatpush.msrb.mxu2 %v1421_v55  ;;  %v578_v3 = vsub.f32 %v1505_v24, %v577_v25 }
  0x35   : > { %435 = vmatpush.msrb.mxu0 %v297_v29  ;;  %556 = vmatpush.msrb.mxu3 %v555_v2  ;;  %v840_v2 = vlaneseq }
  0x36   : > { %468 = vmatpush.msrb.mxu1 %v1323_v4  ;;  %505 = vmatpush.msrb.mxu2 %v1438_v0  ;;  %v584_v4 = vsub.f32 %v1512_v6, %v583_v27  ;;  %v579_v22 = vand.u32 4294901760, %v578_v3 }
  0x37   : > { %439 = vmatpush.msrb.mxu0 %v303_v34  ;;  %562 = vmatpush.msrb.mxu3 %v561_v17 }
  0x38   : > { %367 = vmatmul.f32.gmra.mxu2 %v1446_v8  ;;  %404 = vmatmul.f32.gmra.mxu3 %v1463_v33 }
  0x39   : > { %470 = vmatpush.msrb.mxu1 %v1325_v5  ;;  %507 = vmatpush.msrb.mxu2 %v1456_v26  ;;  %v585_v5 = vand.u32 4294901760, %v584_v4  ;;  %v841_v4 = vand.u32 127, %v840_v2 }
  0x3a   : > { %443 = vmatpush.msrb.mxu0 %v309_v49  ;;  %568 = vmatpush.msrb.mxu3 %v567_v13 }
  0x3b   : > { %472 = vmatpush.msrb.mxu1 %v1327_v9  ;;  %509 = vmatpush.msrb.mxu2 %v1466_v37 }
  0x3c   : > { %447 = vmatpush.msrb.mxu0 %v315_v57  ;;  %574 = vmatpush.msrb.mxu3 %v573_v20 }
  0x3d   : > { %324 = vmatmul.f32.gmra.mxu1 %v1428_v59  ;;  %449 = vmatmul.f32.vlgmr.msrb.gmra.mxu0 %v1366_v28 }
  0x3e   : > { %474 = vmatpush.msrb.mxu1 %v1329_v10  ;;  %511 = vmatpush.msrb.mxu2 %v1481_v47 }
  0x3f   : > { %580 = vmatpush.msrb.mxu3 %v579_v22  ;;  %606 = vmatpush.msra.mxu0 %v1418_v53 }
  0x40   : > { %476 = vmatpush.msrb.mxu1 %v1331_v11  ;;  %513 = vmatpush.msrb.mxu2 %v1493_v52 }
  0x41   : > { %586 = vmatpush.msrb.mxu3 %v585_v5  ;;  %609 = vmatpush.msra.mxu0 %v1426_v58 }
  0x42   : > { %478 = vmatpush.msrb.mxu1 %v1345_v18  ;;  %519 = vmatmul.f32.vlgmr.msrb.gmra.mxu2 %v1432_v61 }
  0x43   : > { %588 = vmatmul.f32.vlgmr.msrb.gmra.mxu3 %v1366_v28  ;;  %687 = vmatpush.msra.mxu2 %v541_v62 }
  0x44   : > { %612 = vmatpush.msra.mxu0 %v1436_v63  ;;  %480 = vmatpush.msrb.mxu1 %v1353_v21 }
  0x45   : > { %691 = vmatpush.msra.mxu2 %v547_v7  ;;  %734 = vmatpush.msra.mxu3 %v1404_v46 }
  0x46   : > { %615 = vmatpush.msra.mxu0 %v1454_v14  ;;  %482 = vmatmul.f32.vlgmr.msrb.gmra.mxu1 %v1366_v28 }
  0x47   : > { %453 = vmatmul.f32.gmra.mxu0 %v1428_v59  ;;  %648 = vmatpush.msra.mxu1 %v1404_v46 }
  0x48   : > { %695 = vmatpush.msra.mxu2 %v553_v35  ;;  %736 = vmatpush.msra.mxu3 %v1411_v50 }
  0x49   : > { %618 = vmatpush.msra.mxu0 %v1474_v39  ;;  %650 = vmatpush.msra.mxu1 %v1411_v50 }
  0x4a   : > { %699 = vmatpush.msra.mxu2 %v559_v45  ;;  %738 = vmatpush.msra.mxu3 %v1421_v55 }
  0x4b   : > { %621 = vmatpush.msra.mxu0 %v1486_v51  ;;  %527 = vmatmul.f32.gmra.mxu2 %v1499_v60 }
  0x4c   : > { %592 = vmatmul.f32.gmra.mxu3 %v1428_v59  ;;  %652 = vmatpush.msra.mxu1 %v1421_v55 }
  0x4d   : > { %703 = vmatpush.msra.mxu2 %v565_v56  ;;  %740 = vmatpush.msra.mxu3 %v1438_v0 }
  0x4e   : > { %624 = vmatpush.msra.mxu0 %v1505_v24  ;;  %654 = vmatpush.msra.mxu1 %v1438_v0 }
  0x4f   : > { %707 = vmatpush.msra.mxu2 %v571_v1  ;;  %742 = vmatpush.msra.mxu3 %v1456_v26 }
  0x50   : > { %627 = vmatpush.msra.mxu0 %v1512_v6  ;;  %486 = vmatmul.f32.gmra.mxu1 %v1428_v59 }
  0x51   : > { %630 = vmatmul.f32.vlgmr.msra.gmra.mxu0 %v1386_v36  ;;  %656 = vmatpush.msra.mxu1 %v1456_v26 }
  0x52   : > { %711 = vmatpush.msra.mxu2 %v577_v25  ;;  %744 = vmatpush.msra.mxu3 %v1466_v37 }
  0x53   : > { %658 = vmatpush.msra.mxu1 %v1466_v37 }
  0x54   : > { %715 = vmatpush.msra.mxu2 %v583_v27  ;;  %746 = vmatpush.msra.mxu3 %v1481_v47 }
  0x55   : > { %660 = vmatpush.msra.mxu1 %v1481_v47  ;;  %717 = vmatmul.f32.vlgmr.msra.gmra.mxu2 %v1366_v28 }
  0x56   : > { %748 = vmatpush.msra.mxu3 %v1493_v52 }
  0x57   : > { %662 = vmatpush.msra.mxu1 %v1493_v52  ;;  %750 = vmatmul.f32.vlgmr.msra.gmra.mxu3 %v1366_v28 }
  0x58   : > { %666 = vmatmul.f32.vlgmr.msra.gmra.mxu1 %v1399_v44 }
  0x59   : > { %635 = vmatmul.f32.gmra.mxu0 %v1446_v8 }
  0x5d   : > { %721 = vmatmul.f32.gmra.mxu2 %v1428_v59 }
  0x5f   : > { %754 = vmatmul.f32.gmra.mxu3 %v1428_v59 }
  0x60   : > { %672 = vmatmul.f32.gmra.mxu1 %v1463_v33 }
  0xa7   : > { %v252_v9 = vpop.f32.mrf.mxu0 }
  0xb0   : > { %v321_v10 = vpop.f32.mrf.mxu1  ;;  %v260_v18 = vpop.f32.mrf.mxu0 }
  0xb1   : > { %v363_v11 = vpop.f32.mrf.mxu2  ;;  %v399_v21 = vpop.f32.mrf.mxu3  ;;  %v322_v29 = vadd.f32 %v321_v10, %v252_v9  ;;  %v842_v10 = vadd.s32 128, %v841_v4 }
  0xb3   : > { %v364_v36 = vadd.f32 %v363_v11, %v322_v29 }
  0xb5   : > { %v400_v44 = vadd.f32 %v399_v21, %v364_v36 }
  0xba   : > { %v325_v30 = vpop.f32.mrf.mxu1  ;;  %v450_v28 = vpop.f32.mrf.mxu0 }
  0xbb   : > { %v368_v34 = vpop.f32.mrf.mxu2  ;;  %v405_v41 = vpop.f32.mrf.mxu3  ;;  %v451_v46 = vadd.f32 %v450_v28, %v400_v44  ;;  %v326_v15 = vadd.f32 %v325_v30, %v260_v18 }
  0xbd   : > { %v369_v17 = vadd.f32 %v368_v34, %v326_v15  ;;  %v843_v34 = vcvt.s32.f32 %v841_v4 }
  0xbf   : > { %v406_v22 = vadd.f32 %v405_v41, %v369_v17 }
  0xc3   : > { %v483_v49 = vpop.f32.mrf.mxu1 }
  0xc4   : > { %v1613_v50 = vadd.f32 %v483_v49, %v451_v46  ;;  %v454_v57 = vpop.f32.mrf.mxu0  ;;  %v844_v46 = vcvt.s32.f32 %v842_v10 }
  0xc5   : > { %v520_v53 = vpop.f32.mrf.mxu2  ;;  %v455_v11 = vadd.f32 %v454_v57, %v406_v22 }
  0xc6   : > { %v758_v55 = vmul.f32 %v1613_v50, %v1613_v50  ;;  %vm792_vm1 = vcmp.lt.f32.partialorder %v1613_v50, 1e-08  ;;  %vm794_vm2 = vcmp.gt.f32.partialorder %v1613_v50, -1e-08  ;;  %v589_v58 = vpop.f32.mrf.mxu3 }
  0xc7   : > { %vm796_vm3 = vmand %vm792_vm1, %vm794_vm2  ;;  %v590_v31 = vadd.f32 %v589_v58, %v520_v53 }
  0xc8   : > { %v1620_v59 = vsel %vm796_vm3, 1e-08, %v1613_v50  ;;  %v762_v62 = vrot.slane %v758_v55, 4  ;;  %vm858_vm3 = vcmask 1043456  }
  0xc9   : > { %v800_v61 = vmul.f32 %v1620_v59, %v1620_v59 }
  0xca   : > { %v1624_v7 = vadd.f32 %v762_v62, %v758_v55 }
  0xcb   : > { %v804_v63 = vrot.slane %v800_v61, 4 }
  0xcc   : > { %1095 = vrsqrt.f32 %v1624_v7  ;;  %vm775_vm10 = vcmp.eq.f32.partialorder %v1624_v7, inf  ;;  %vm777_vm12 = vcmp.eq.f32.partialorder %v1624_v7, 0.0 }
  0xcd   : > { %v487_v0 = vpop.f32.mrf.mxu1  ;;  %v1626_v14 = vadd.f32 %v804_v63, %v758_v55 }
  0xce   : > { %v528_v8 = vpop.f32.mrf.mxu2  ;;  %v631_v26 = vpop.f32.mrf.mxu0  ;;  %v488_v30 = vadd.f32 %v487_v0, %v455_v11 }
  0xcf   : > { %v593_v32 = vpop.f32.mrf.mxu3  ;;  %1097 = vrsqrt.f32 %v1626_v14  ;;  %v632_v33 = vadd.f32 %v631_v26, %v590_v31  ;;  %vm816_vm8 = vweird.f32 %v1626_v14 }
  0xd0   : > { %v594_v54 = vadd.f32 %v593_v32, %v528_v8  ;;  %v845_v58 = vsub.f32 %v488_v30, %v843_v34 }
  0xd2   : > { %v1096_v38 = vpop.eup %1095  ;;  %v847_v31 = vand.u32 2147483647, %v845_v58 }
  0xd3   : > { %v769_v45 = vmul.f32 %v1096_v38, %v1624_v7 }
  0xd4   : > { %vm849_vm15 = vcmp.lt.f32.partialorder %v847_v31, 0.5 }
  0xd5   : > { %v667_v35 = vpop.f32.mrf.mxu1  ;;  %v1098_v42 = vpop.eup %1097  ;;  %v770_v52 = vmul.f32 %v1096_v38, %v769_v45 }
  0xd6   : > { %v668_v37 = vadd.f32 %v667_v35, %v632_v33  ;;  %v811_v48 = vmul.f32 %v1098_v42, %v1626_v14  ;;  %v636_v23 = vpop.f32.mrf.mxu0  ;;  %vm817_vm7 = vweird.f32 %v1098_v42  ;;  %v778_v14 = vand.u32 2147483648, %v1624_v7 }
  0xd7   : > { %v637_v6 = vadd.f32 %v636_v23, %v594_v54  ;;  %v771_v19 = vmul.f32 0.5, %v770_v52  ;;  %vm818_vm9 = vmor %vm816_vm8, %vm817_vm7 }
  0xd8   : > { %v718_v39 = vpop.f32.mrf.mxu2  ;;  %v812_v1 = vmul.f32 %v1098_v42, %v811_v48 }
  0xd9   : > { %v719_v40 = vadd.f32 %v718_v39, %v668_v37  ;;  %v772_v5 = vsub.f32 1.5, %v771_v19 }
  0xda   : > { %v751_v43 = vpop.f32.mrf.mxu3  ;;  %v813_v20 = vmul.f32 0.5, %v812_v1 }
  0xdb   : > { %v1631_v47 = vadd.f32 %v751_v43, %v719_v40  ;;  %v773_v28 = vmul.f32 %v1096_v38, %v772_v5 }
  0xdc   : > { %v814_v29 = vsub.f32 1.5, %v813_v20 }
  0xdd   : > { %v759_v51 = vmul.f32 %v1631_v47, %v1631_v47  ;;  %vm793_vm4 = vcmp.lt.f32.partialorder %v1631_v47, 1e-08  ;;  %vm795_vm5 = vcmp.gt.f32.partialorder %v1631_v47, -1e-08  ;;  %v673_v16 = vpop.f32.mrf.mxu1  ;;  %v774_v57 = vmul.f32 %v773_v28, %v1624_v7 }
  0xde   : > { %vm797_vm6 = vmand %vm793_vm4, %vm795_vm5  ;;  %v674_v27 = vadd.f32 %v673_v16, %v637_v6  ;;  %v815_v55 = vmul.f32 %v1098_v42, %v814_v29 }
  0xdf   : > { %v763_v56 = vrot.slane %v759_v51, 4  ;;  %v1639_v60 = vsel %vm797_vm6, 1e-08, %v1631_v47  ;;  %v776_v33 = vsel %vm775_vm10, %v1624_v7, %v774_v57 }
  0xe0   : > { %v801_v24 = vmul.f32 %v1639_v60, %v1639_v60  ;;  %v722_v13 = vpop.f32.mrf.mxu2  ;;  %v819_v8 = vsel %vm818_vm9, %v1098_v42, %v815_v55  ;;  %v779_v43 = vsel %vm777_vm12, %v778_v14, %v776_v33 }
  0xe1   : > { %v1643_v12 = vadd.f32 %v763_v56, %v759_v51  ;;  %v723_v9 = vadd.f32 %v722_v13, %v674_v27  ;;  %v834_v38 = vrot.slane %v819_v8, 4  ;;  %v830_v7 = vmul.f32 %v819_v8, %v1613_v50 }
  0xe2   : > { %v805_v25 = vrot.slane %v801_v24, 4  ;;  %v755_v18 = vpop.f32.mrf.mxu3  ;;  %v851_v56 = vsel %vm849_vm15, %v779_v43, 0.0 }
  0xe3   : > { %1099 = vrsqrt.f32 %v1643_v12  ;;  %v756_v44 = vadd.f32 %v755_v18, %v723_v9  ;;  %vm787_vm13 = vcmp.eq.f32.partialorder %v1643_v12, inf  ;;  %v790_v40 = vand.u32 2147483648, %v1643_v12 }
  0xe4   : > { %v809_v3 = vadd.f32 %v805_v25, %v759_v51  ;;  %vm789_vm0 = vcmp.eq.f32.partialorder %v1643_v12, 0.0  ;;  %v838_v15 = vmul.f32 %v834_v38, %v1620_v59  ;;  %v853_v50 = vmul.f32 %v851_v56, %v830_v7 }
  0xe5   : > { %v846_v63 = vsub.f32 %v756_v44, %v844_v46 }
  0xe6   : > { %1101 = vrsqrt.f32 %v809_v3  ;;  %vm826_vm14 = vweird.f32 %v809_v3  ;;  %v864_v59 = vrot.slane %v838_v15, 4 }
  0xe7   : > { %v848_v37 = vand.u32 2147483647, %v846_v63 }
  0xe8   : > { %v868_v6 = vmul.f32 %v864_v59, %v851_v56 }
  0xe9   : > { %v1100_v21 = vpop.eup %1099  ;;  %vm850_vm2 = vcmp.lt.f32.partialorder %v848_v37, 0.5 }
  0xea   : > { %v781_v36 = vmul.f32 %v1100_v21, %v1643_v12 }
  0xec   : > { %v1102_v49 = vpop.eup %1101  ;;  %v782_v53 = vmul.f32 %v1100_v21, %v781_v36 }
  0xed   : > { %v821_v41 = vmul.f32 %v1102_v49, %v809_v3  ;;  %vm827_vm11 = vweird.f32 %v1102_v49 }
  0xee   : > { %v783_v61 = vmul.f32 0.5, %v782_v53  ;;  %vm828_vm1 = vmor %vm826_vm14, %vm827_vm11 }
  0xef   : > { %v822_v62 = vmul.f32 %v1102_v49, %v821_v41 }
  0xf0   : > { %v784_v0 = vsub.f32 1.5, %v783_v61 }
  0xf1   : > { %v823_v26 = vmul.f32 0.5, %v822_v62 }
  0xf2   : > { %v785_v32 = vmul.f32 %v1100_v21, %v784_v0 }
  0xf3   : > { %v824_v35 = vsub.f32 1.5, %v823_v26 }
  0xf4   : > { %v786_v39 = vmul.f32 %v785_v32, %v1643_v12 }
  0xf5   : > { %v825_v42 = vmul.f32 %v1102_v49, %v824_v35 }
  0xf6   : > { %v788_v45 = vsel %vm787_vm13, %v1643_v12, %v786_v39 }
  0xf7   : > { %v791_v48 = vsel %vm789_vm0, %v790_v40, %v788_v45  ;;  %v829_v51 = vsel %vm828_vm1, %v1102_v49, %v825_v42 }
  0xf8   : > { %v831_v23 = vmul.f32 %v829_v51, %v1631_v47  ;;  %v835_v52 = vrot.slane %v829_v51, 4  ;;  %v852_v54 = vsel %vm850_vm2, %v791_v48, 0.0 }
  0xfa   : > { %v839_v16 = vmul.f32 %v835_v52, %v1639_v60  ;;  %v854_v24 = vmul.f32 %v852_v54, %v831_v23 }
  0xfc   : > { %v857_v47 = vrot.slane %v854_v24, 4  ;;  %v865_v1 = vrot.slane %v839_v16, 4 }
  0xfe   : > { %v869_v60 = vmul.f32 %v865_v1, %v852_v54  ;;  %v859_v2 = vsel %vm858_vm3, %v853_v50, %v857_v47 }
  0xff   : > { %861 = vst [vmem:[%s184_s20] sm:$0xff] %v859_v2 }
 0x100   : > { %v872_v12 = vrot.slane %v869_v60, 4 }
 0x101   : > { %1160 = shalt.err (!%p1157_p8)
}
 0x102   : > { %1042 = dma.vmem_to_hbm [thread:$0]  (%p1294_p5), %s896_s24, 128, %s898_s25, %s877_s5   ;;  %v873_v17 = vsel %vm858_vm3, %v868_v6, %v872_v12 }
 0x103   : > { %875 = vst [vmem:[%s191_s29] sm:$0xff] %v873_v17  ;;  %s882_s11 = scalar_lea.sflag [#allocation7], %s1652_s9  ;;  %s1175_s20 = sshra.s32 %s913_s4, 4  ;;  %s1176_s20 = int_to_ptr.hbm [resolvable:$true] %s1175_s20 }
 0x104   : > { %s1177_s26 = scalar_lea.hbm %s1176_s20, 8  ;;  %s1181_s6 = scalar_lea.hbm %s1721_s3, 16 }
 0x105   : > { %p1178_p9 = scmp.ne.s32.totalorder %s1176_s20, %s1177_s26  ;;  %p1182_p12 = scmp.lt.s32.totalorder %s1176_s20, %s1721_s3 }
 0x106   : > { %p1183_p13 = scmp.lt.s32.totalorder %s1181_s6, %s1177_s26 }
 0x107   : > { %p1179_p10 = pnand %p1178_p9, %p1294_p5 }
 0x108   : > { %p1184_p0 = por %p1183_p13, %p1182_p12 }
 0x109   : > { %p1180_p11 = pneg %p1179_p10 }
 0x10b   : > { %p1185_p1 = pnand %p1184_p0, %p1180_p11 }
 0x10d   : > { %1188 = shalt.err (!%p1185_p1)
}
 0x10e   : > { %1043 = dma.vmem_to_hbm [thread:$0]  (%p1294_p5), %s911_s30, 128, %s913_s4, %s882_s11  }
 0x10f PF: > { %p1059_p2 = scmp.ge.s32.totalorder %s1231_s15, 2  ;;  %s924_s9 = sand.u32 1, %s1219_s12  }
 0x110   : > { %s925_s24 = scalar_lea.sflag [#allocation4], %s924_s9 }
 0x111   : > { %p1051_p3 = pnand %p1059_p2, %p1298_p6 }
 0x113   : > { %p1052_p4 = pneg %p1051_p3 }
 0x115   : > { %1210 = dma.done.wait (%p1052_p4), %s925_s24, 128  }
 0x116   : > { %1212 = vsyncadd (%p1052_p4), %s925_s24, 4294967168  ;;  %s935_s25 = scalar_lea.sflag [#allocation7], %s924_s9 }
 0x117   : > { %1214 = dma.done.wait (%p1052_p4), %s935_s25, 128  }
 0x118   : > { %1216 = vsyncadd (%p1052_p4), %s935_s25, 4294967168  ;;  %p18_p5 = scmp.ge.s32.totalorder %s1281_s18, 4   ;;  %s1724_s12 = smov %s1223_s13 }
 0x119   : > { %s1725_s13 = smov %s1227_s14  ;;  %s1726_s14 = smov %s1292_s21 }
 0x11a   : > { %s1727_s15 = smov %s1281_s18  ;;  %20 = sbr.rel (!%p18_p5) target bundleno = 6 (0x6), region = 85 }
 0x11f   :  { %941 = vsyncpa [#allocation3], 1 }
 0x120   :  { %943 = vsyncpa [#allocation3 + $0x1], 1 }
 0x121   :  { %944 = vsyncpa [#allocation4], 1 }
 0x122   :  { %946 = vsyncpa [#allocation4 + $0x1], 1 }
 0x123   :  { %947 = vsyncpa [#allocation7], 1 }
 0x124   :  { %949 = vsyncpa [#allocation7 + $0x1], 1 }

</bundles_post_ra>
